<compile_context>
chip_gen: v7x
topology: tpu7x:2x2x1
jax: 0.10.0
libtpu: 0.0.40
codegen_flags: <defaults>
</compile_context>

<pallas_src>
import functools
import math

import jax
import jax.numpy as jnp
from jax.experimental import pallas as pl
from jax.experimental.pallas import tpu as pltpu


def _make_divisible(v, divisor, min_value=None):
    if min_value is None:
        min_value = divisor
    new_v = max(min_value, int(v + divisor / 2) // divisor * divisor)
    if new_v < 0.9 * v:
        new_v += divisor
    return new_v


def _parallel(n):
    return pltpu.CompilerParams(dimension_semantics=("parallel",) * n)


# ------------------------------ kernels -------------------------------------


def _conv1x1_bias_silu_kernel(x_ref, w_ref, b_ref, o_ref):
    # x:(tm,Cin) f32, w:(Cin,Cout) bf16 (BN scale pre-folded), b:(1,Cout) f32
    y = jnp.dot(x_ref[...].astype(jnp.bfloat16), w_ref[...],
                preferred_element_type=jnp.float32)
    y = y + b_ref[...]
    o_ref[...] = y * jax.nn.sigmoid(y)


def _conv1x1_bias_kernel(x_ref, w_ref, b_ref, o_ref):
    y = jnp.dot(x_ref[...].astype(jnp.bfloat16), w_ref[...],
                preferred_element_type=jnp.float32)
    o_ref[...] = y + b_ref[...]


def _conv1x1_bias_add_kernel(x_ref, res_ref, w_ref, b_ref, o_ref):
    y = jnp.dot(x_ref[...].astype(jnp.bfloat16), w_ref[...],
                preferred_element_type=jnp.float32)
    o_ref[...] = y + b_ref[...] + res_ref[...]


def _dw3x3_silu_pool_kernel(x_ref, w_ref, b_ref, h_ref, pool_ref, xp_ref,
                            *, H, W, Ho, Wo, stride):
    # x:(1,H,W,C) f32, w:(9,C) f32 (BN folded), b:(1,C) f32
    # outputs: h:(1,Ho,Wo,C) SiLU activations, pool:(1,1,C) spatial mean (for SE)
    # xp: VMEM scratch (1,H+2,W+2,C) -> zero halo built in VMEM (no HBM pad copy)
    C = x_ref.shape[-1]
    xp_ref[...] = jnp.zeros_like(xp_ref)
    xp_ref[:, pl.ds(1, H), pl.ds(1, W), :] = x_ref[...]
    xp = xp_ref[...]
    acc = jnp.zeros((1, Ho, Wo, C), jnp.float32)
    for dy in range(3):
        for dx in range(3):
            tap = xp[:, dy:dy + (Ho - 1) * stride + 1:stride,
                        dx:dx + (Wo - 1) * stride + 1:stride, :]
            acc = acc + tap * w_ref[dy * 3 + dx, :]
    y = acc + b_ref[...]
    y = y * jax.nn.sigmoid(y)
    h_ref[...] = y
    pool_ref[0] = jnp.sum(y.reshape(Ho * Wo, C), axis=0, keepdims=True) * (1.0 / (Ho * Wo))


def _se_gate_kernel(p_ref, w1_ref, b1_ref, w2_ref, b2_ref, g_ref):
    # p:(N,C) pooled means -> g:(N,C) sigmoid gates (tiny FCs, kept f32)
    z = jnp.dot(p_ref[...], w1_ref[...], preferred_element_type=jnp.float32) + b1_ref[...]
    z = z * jax.nn.sigmoid(z)
    g_ref[...] = jax.nn.sigmoid(
        jnp.dot(z, w2_ref[...], preferred_element_type=jnp.float32) + b2_ref[...])


def _proj_gate_kernel(h_ref, g_ref, w_ref, b_ref, o_ref):
    # h:(1,tm,Ch), g:(1,1,Ch) per-sample SE gate, w:(Ch,Cout) bf16, b:(1,Cout)
    hg = h_ref[0] * g_ref[0]
    y = jnp.dot(hg.astype(jnp.bfloat16), w_ref[...], preferred_element_type=jnp.float32)
    o_ref[0] = y + b_ref[...]


def _proj_gate_add_kernel(h_ref, g_ref, res_ref, w_ref, b_ref, o_ref):
    hg = h_ref[0] * g_ref[0]
    y = jnp.dot(hg.astype(jnp.bfloat16), w_ref[...], preferred_element_type=jnp.float32)
    o_ref[0] = y + b_ref[...] + res_ref[0]


def _conv3x3_im2col_kernel(x_ref, w_ref, b_ref, o_ref, xp_ref,
                           *, H, W, Ho, Wo, stride, Cin, Cout):
    # Dense 3x3 conv as ONE matmul with K=9*Cin: w:(9*Cin,Cout) bf16 (BN folded)
    xp_ref[...] = jnp.zeros_like(xp_ref)
    xp_ref[:, pl.ds(1, H), pl.ds(1, W), :] = x_ref[...]
    xp = xp_ref[...]
    taps = []
    for dy in range(3):
        for dx in range(3):
            tap = xp[0, dy:dy + (Ho - 1) * stride + 1:stride,
                        dx:dx + (Wo - 1) * stride + 1:stride, :]
            taps.append(tap.reshape(Ho * Wo, Cin))
    a = jnp.concatenate(taps, axis=-1).astype(jnp.bfloat16)      # (Ho*Wo, 9*Cin)
    y = jnp.dot(a, w_ref[...], preferred_element_type=jnp.float32) + b_ref[...]
    y = y * jax.nn.sigmoid(y)
    o_ref[...] = y.reshape(1, Ho, Wo, Cout)


def _conv3x3_taps_kernel(x_ref, w_ref, b_ref, o_ref, xp_ref,
                         *, H, W, Ho, Wo, stride, Cin, Cout):
    # Fallback: 9 small-K matmuls accumulated in f32.  w:(9,Cin,Cout) bf16
    xp_ref[...] = jnp.zeros_like(xp_ref)
    xp_ref[:, pl.ds(1, H), pl.ds(1, W), :] = x_ref[...]
    xp = xp_ref[...]
    acc = jnp.zeros((Ho * Wo, Cout), jnp.float32)
    for dy in range(3):
        for dx in range(3):
            tap = xp[0, dy:dy + (Ho - 1) * stride + 1:stride,
                        dx:dx + (Wo - 1) * stride + 1:stride, :]
            acc = acc + jnp.dot(tap.reshape(Ho * Wo, Cin).astype(jnp.bfloat16),
                                w_ref[dy * 3 + dx],
                                preferred_element_type=jnp.float32)
    y = acc + b_ref[...]
    y = y * jax.nn.sigmoid(y)
    o_ref[...] = y.reshape(1, Ho, Wo, Cout)


# ------------------------------ wrappers ------------------------------------


def _pick_row_tile(M, cin, cout, vmem_budget_bytes=8 * 1024 * 1024):
    """Largest row tile dividing M whose double-buffered in+out blocks fit the budget."""
    per_row = 2 * 4 * (cin + cout)                 # f32 in + f32 out, x2 double buffer
    cap = max(8, vmem_budget_bytes // max(per_row, 1))
    for t in (4096, 2048, 1024, 512, 256, 128, 64, 32, 16, 8):
        if t <= cap and M % t == 0:
            return t
    # TODO(synk): masked-tail handling for M not divisible by any candidate tile.
    return M


def conv1x1_bias_silu(x2d, w, b):
    M, Cin = x2d.shape
    Cout = w.shape[1]
    tm = _pick_row_tile(M, Cin, Cout)
    return pl.pallas_call(
        _conv1x1_bias_silu_kernel,
        out_shape=jax.ShapeDtypeStruct((M, Cout), jnp.float32),
        grid=(M // tm,),
        in_specs=[pl.BlockSpec((tm, Cin), lambda i: (i, 0)),
                  pl.BlockSpec((Cin, Cout), lambda i: (0, 0)),
                  pl.BlockSpec((1, Cout), lambda i: (0, 0))],
        out_specs=pl.BlockSpec((tm, Cout), lambda i: (i, 0)),
        compiler_params=_parallel(1),
    )(x2d, w, b)


def conv1x1_bias(x2d, w, b):
    M, Cin = x2d.shape
    Cout = w.shape[1]
    tm = _pick_row_tile(M, Cin, Cout)
    return pl.pallas_call(
        _conv1x1_bias_kernel,
        out_shape=jax.ShapeDtypeStruct((M, Cout), jnp.float32),
        grid=(M // tm,),
        in_specs=[pl.BlockSpec((tm, Cin), lambda i: (i, 0)),
                  pl.BlockSpec((Cin, Cout), lambda i: (0, 0)),
                  pl.BlockSpec((1, Cout), lambda i: (0, 0))],
        out_specs=pl.BlockSpec((tm, Cout), lambda i: (i, 0)),
        compiler_params=_parallel(1),
    )(x2d, w, b)


def conv1x1_bias_add(x2d, res2d, w, b):
    M, Cin = x2d.shape
    Cout = w.shape[1]
    tm = _pick_row_tile(M, Cin + Cout, Cout)
    return pl.pallas_call(
        _conv1x1_bias_add_kernel,
        out_shape=jax.ShapeDtypeStruct((M, Cout), jnp.float32),
        grid=(M // tm,),
        in_specs=[pl.BlockSpec((tm, Cin), lambda i: (i, 0)),
                  pl.BlockSpec((tm, Cout), lambda i: (i, 0)),
                  pl.BlockSpec((Cin, Cout), lambda i: (0, 0)),
                  pl.BlockSpec((1, Cout), lambda i: (0, 0))],
        out_specs=pl.BlockSpec((tm, Cout), lambda i: (i, 0)),
        compiler_params=_parallel(1),
    )(x2d, res2d, w, b)


def dw3x3_silu_pool(x, w9, b, stride):
    """Depthwise 3x3 + bias + SiLU, also emits the per-sample spatial mean (SE pool)."""
    N, H, W, C = x.shape
    Ho = (H - 1) // stride + 1
    Wo = (W - 1) // stride + 1
    kern = functools.partial(_dw3x3_silu_pool_kernel, H=H, W=W, Ho=Ho, Wo=Wo, stride=stride)
    return pl.pallas_call(
        kern,
        out_shape=(jax.ShapeDtypeStruct((N, Ho, Wo, C), jnp.float32),
                   jax.ShapeDtypeStruct((N, 1, C), jnp.float32)),
        grid=(N,),
        in_specs=[pl.BlockSpec((1, H, W, C), lambda n: (n, 0, 0, 0)),
                  pl.BlockSpec((9, C), lambda n: (0, 0)),
                  pl.BlockSpec((1, C), lambda n: (0, 0))],
        out_specs=(pl.BlockSpec((1, Ho, Wo, C), lambda n: (n, 0, 0, 0)),
                   pl.BlockSpec((1, 1, C), lambda n: (n, 0, 0))),
        scratch_shapes=[pltpu.VMEM((1, H + 2, W + 2, C), jnp.float32)],
        compiler_params=_parallel(1),
    )(x, w9, b)


def se_gates(pool, w1, b1, w2, b2):
    """pool:(N,C) -> sigmoid gates (N,C).  Tiny; single grid step."""
    N, C = pool.shape
    mid = w1.shape[1]
    return pl.pallas_call(
        _se_gate_kernel,
        out_shape=jax.ShapeDtypeStruct((N, C), jnp.float32),
        grid=(1,),
        in_specs=[pl.BlockSpec((N, C), lambda i: (0, 0)),
                  pl.BlockSpec((C, mid), lambda i: (0, 0)),
                  pl.BlockSpec((1, mid), lambda i: (0, 0)),
                  pl.BlockSpec((mid, C), lambda i: (0, 0)),
                  pl.BlockSpec((1, C), lambda i: (0, 0))],
        out_specs=pl.BlockSpec((N, C), lambda i: (0, 0)),
        compiler_params=pltpu.CompilerParams(dimension_semantics=("arbitrary",)),
    )(pool, w1, b1, w2, b2)


def proj_gate(h3, g3, w, b):
    N, HW, Ch = h3.shape
    Cout = w.shape[1]
    tm = _pick_row_tile(HW, Ch, Cout)
    return pl.pallas_call(
        _proj_gate_kernel,
        out_shape=jax.ShapeDtypeStruct((N, HW, Cout), jnp.float32),
        grid=(N, HW // tm),
        in_specs=[pl.BlockSpec((1, tm, Ch), lambda n, i: (n, i, 0)),
                  pl.BlockSpec((1, 1, Ch), lambda n, i: (n, 0, 0)),
                  pl.BlockSpec((Ch, Cout), lambda n, i: (0, 0)),
                  pl.BlockSpec((1, Cout), lambda n, i: (0, 0))],
        out_specs=pl.BlockSpec((1, tm, Cout), lambda n, i: (n, i, 0)),
        compiler_params=_parallel(2),
    )(h3, g3, w, b)


def proj_gate_add(h3, g3, res3, w, b):
    N, HW, Ch = h3.shape
    Cout = w.shape[1]
    tm = _pick_row_tile(HW, Ch + Cout, Cout)
    return pl.pallas_call(
        _proj_gate_add_kernel,
        out_shape=jax.ShapeDtypeStruct((N, HW, Cout), jnp.float32),
        grid=(N, HW // tm),
        in_specs=[pl.BlockSpec((1, tm, Ch), lambda n, i: (n, i, 0)),
                  pl.BlockSpec((1, 1, Ch), lambda n, i: (n, 0, 0)),
                  pl.BlockSpec((1, tm, Cout), lambda n, i: (n, i, 0)),
                  pl.BlockSpec((Ch, Cout), lambda n, i: (0, 0)),
                  pl.BlockSpec((1, Cout), lambda n, i: (0, 0))],
        out_specs=pl.BlockSpec((1, tm, Cout), lambda n, i: (n, i, 0)),
        compiler_params=_parallel(2),
    )(h3, g3, res3, w, b)


_IM2COL_SUPPORTED = None  # resolved lazily on the first dense-3x3 call


def conv3x3_bias_silu(x, w_flat, b, stride):
    """Dense 3x3 conv + bias + SiLU.  w_flat:(9*Cin,Cout) bf16 (BN scale folded)."""
    global _IM2COL_SUPPORTED
    N, H, W, Cin = x.shape
    Cout = w_flat.shape[-1]
    Ho = (H - 1) // stride + 1
    Wo = (W - 1) // stride + 1
    common = dict(H=H, W=W, Ho=Ho, Wo=Wo, stride=stride, Cin=Cin, Cout=Cout)

    def call(kern, wk, w_shape):
        return pl.pallas_call(
            kern,
            out_shape=jax.ShapeDtypeStruct((N, Ho, Wo, Cout), jnp.float32),
            grid=(N,),
            in_specs=[pl.BlockSpec((1, H, W, Cin), lambda n: (n, 0, 0, 0)),
                      pl.BlockSpec(w_shape, lambda n: (0,) * len(w_shape)),
                      pl.BlockSpec((1, Cout), lambda n: (0, 0))],
            out_specs=pl.BlockSpec((1, Ho, Wo, Cout), lambda n: (n, 0, 0, 0)),
            scratch_shapes=[pltpu.VMEM((1, H + 2, W + 2, Cin), jnp.float32)],
            compiler_params=_parallel(1),
        )(x, wk, b)

    if _IM2COL_SUPPORTED is not False:
        try:
            out = call(functools.partial(_conv3x3_im2col_kernel, **common),
                       w_flat, (9 * Cin, Cout))
            if _IM2COL_SUPPORTED is None:
                jax.block_until_ready(out)
                _IM2COL_SUPPORTED = True
            return out
        except Exception:
            # TODO(synk): lane-dim concat not lowerable on this Mosaic build; 9-tap fallback.
            _IM2COL_SUPPORTED = False
    w9 = w_flat.reshape(9, Cin, Cout)
    return call(functools.partial(_conv3x3_taps_kernel, **common), w9, (9, Cin, Cout))


def mbconv_v2(x, q, *, stride, use_se, identity):
    """Pallas forward of MBConvv2.  x:(N,H,W,Cin) f32 NHWC, q = prepare_params_*(p)."""
    N, H, W, Cin = x.shape
    if use_se:
        Ch = q['w_pw1'].shape[1]
        h = conv1x1_bias_silu(x.reshape(N * H * W, Cin), q['w_pw1'], q['b1'])
        h = h.reshape(N, H, W, Ch)
        h, pool = dw3x3_silu_pool(h, q['w_dw'], q['b2'], stride)
        g = se_gates(pool.reshape(N, Ch), q['se_w1'], q['se_b1'], q['se_w2'], q['se_b2'])
        _, Ho, Wo, _ = h.shape
        h3 = h.reshape(N, Ho * Wo, Ch)
        g3 = g.reshape(N, 1, Ch)
        if identity:
            out = proj_gate_add(h3, g3, x.reshape(N, H * W, Cin), q['w_pw2'], q['b3'])
        else:
            out = proj_gate(h3, g3, q['w_pw2'], q['b3'])
        return out.reshape(N, Ho, Wo, -1)
    else:
        h = conv3x3_bias_silu(x, q['w_c3'], q['b1'], stride)
        _, Ho, Wo, Ch = h.shape
        h2 = h.reshape(N * Ho * Wo, Ch)
        if identity:
            out = conv1x1_bias_add(h2, x.reshape(N * H * W, Cin), q['w_pw2'], q['b2'])
        else:
            out = conv1x1_bias(h2, q['w_pw2'], q['b2'])
        return out.reshape(N, Ho, Wo, -1)


# --------------------------- params / folding / reference --------------------


def _fold_bn(gamma, beta, mean, var, eps=1e-5):
    scale = gamma / jnp.sqrt(var + eps)
    bias = beta - mean * scale
    return scale.reshape(1, -1).astype(jnp.float32), bias.reshape(1, -1).astype(jnp.float32)


def _init_bn(key, c):
    k1, k2, k3, k4 = jax.random.split(key, 4)
    gamma = jax.random.uniform(k1, (c,), minval=0.5, maxval=1.5)
    beta = 0.1 * jax.random.normal(k2, (c,))
    mean = 0.1 * jax.random.normal(k3, (c,))
    var = jax.random.uniform(k4, (c,), minval=0.5, maxval=1.5)
    return _fold_bn(gamma, beta, mean, var)


def init_params_se(key, in_planes, out_planes, expand_ratio):
    hidden = round(in_planes * expand_ratio)
    mid = _make_divisible(in_planes // 4, 8)
    ks = jax.random.split(key, 10)
    p = {}
    p['w_pw1'] = (jax.random.normal(ks[0], (in_planes, hidden)) / math.sqrt(in_planes)).astype(jnp.float32)
    p['bn1_s'], p['bn1_b'] = _init_bn(ks[1], hidden)
    p['w_dw'] = (jax.random.normal(ks[2], (9, hidden)) / 3.0).astype(jnp.float32)
    p['bn2_s'], p['bn2_b'] = _init_bn(ks[3], hidden)
    p['se_w1'] = (jax.random.normal(ks[4], (hidden, mid)) / math.sqrt(hidden)).astype(jnp.float32)
    p['se_b1'] = (0.1 * jax.random.normal(ks[5], (1, mid))).astype(jnp.float32)
    p['se_w2'] = (jax.random.normal(ks[6], (mid, hidden)) / math.sqrt(mid)).astype(jnp.float32)
    p['se_b2'] = (0.1 * jax.random.normal(ks[7], (1, hidden))).astype(jnp.float32)
    p['w_pw2'] = (jax.random.normal(ks[8], (hidden, out_planes)) / math.sqrt(hidden)).astype(jnp.float32)
    p['bn3_s'], p['bn3_b'] = _init_bn(ks[9], out_planes)
    return p


def init_params_nose(key, in_planes, out_planes, expand_ratio):
    hidden = round(in_planes * expand_ratio)
    ks = jax.random.split(key, 4)
    p = {}
    p['w_c3'] = (jax.random.normal(ks[0], (9, in_planes, hidden)) / math.sqrt(9 * in_planes)).astype(jnp.float32)
    p['bn1_s'], p['bn1_b'] = _init_bn(ks[1], hidden)
    p['w_pw2'] = (jax.random.normal(ks[2], (hidden, out_planes)) / math.sqrt(hidden)).astype(jnp.float32)
    p['bn2_s'], p['bn2_b'] = _init_bn(ks[3], out_planes)
    return p


def prepare_params_se(p):
    """Fold BN scale into conv weights; matmul weights in bf16, VPU (dw) weights f32."""
    q = {}
    q['w_pw1'] = (p['w_pw1'] * p['bn1_s']).astype(jnp.bfloat16)
    q['b1'] = p['bn1_b']
    q['w_dw'] = (p['w_dw'] * p['bn2_s']).astype(jnp.float32)
    q['b2'] = p['bn2_b']
    q['se_w1'], q['se_b1'] = p['se_w1'], p['se_b1']
    q['se_w2'], q['se_b2'] = p['se_w2'], p['se_b2']
    q['w_pw2'] = (p['w_pw2'] * p['bn3_s']).astype(jnp.bfloat16)
    q['b3'] = p['bn3_b']
    return q


def prepare_params_nose(p):
    q = {}
    w = p['w_c3'] * p['bn1_s'][None]                     # (9,Cin,Ch)
    q['w_c3'] = w.reshape(-1, w.shape[-1]).astype(jnp.bfloat16)   # (9*Cin,Ch)
    q['b1'] = p['bn1_b']
    q['w_pw2'] = (p['w_pw2'] * p['bn2_s']).astype(jnp.bfloat16)
    q['b2'] = p['bn2_b']
    return q


def ref_mbconv(x, p, *, stride, use_se, identity):
    """Pure-JAX f32 reference with raw (unfolded) params."""
    silu = lambda v: v * jax.nn.sigmoid(v)
    pad = lambda v: jnp.pad(v, ((0, 0), (1, 1), (1, 1), (0, 0)))
    N, H, W, Cin = x.shape
    Ho = (H - 1) // stride + 1
    Wo = (W - 1) // stride + 1
    if use_se:
        h = silu((x.reshape(-1, Cin) @ p['w_pw1']) * p['bn1_s'] + p['bn1_b'])
        C = h.shape[-1]
        h = h.reshape(N, H, W, C)
        xp = pad(h)
        acc = jnp.zeros((N, Ho, Wo, C), jnp.float32)
        for dy in range(3):
            for dx in range(3):
                acc = acc + xp[:, dy:dy + (Ho - 1) * stride + 1:stride,
                                  dx:dx + (Wo - 1) * stride + 1:stride, :] * p['w_dw'][dy * 3 + dx]
        h = silu(acc * p['bn2_s'] + p['bn2_b'])
        m = h.mean(axis=(1, 2))
        z = silu(m @ p['se_w1'] + p['se_b1'])
        g = jax.nn.sigmoid(z @ p['se_w2'] + p['se_b2'])
        h = h * g[:, None, None, :]
        out = (h.reshape(-1, C) @ p['w_pw2']) * p['bn3_s'] + p['bn3_b']
        out = out.reshape(N, Ho, Wo, -1)
    else:
        Ch = p['w_c3'].shape[-1]
        xp = pad(x)
        acc = jnp.zeros((N, Ho, Wo, Ch), jnp.float32)
        for dy in range(3):
            for dx in range(3):
                tap = xp[:, dy:dy + (Ho - 1) * stride + 1:stride,
                            dx:dx + (Wo - 1) * stride + 1:stride, :]
                acc = acc + jnp.einsum('nhwc,cd->nhwd', tap, p['w_c3'][dy * 3 + dx])
        h = silu(acc * p['bn1_s'] + p['bn1_b'])
        out = (h.reshape(-1, Ch) @ p['w_pw2']) * p['bn2_s'] + p['bn2_b']
        out = out.reshape(N, Ho, Wo, -1)
    if identity:
        out = out + x
    return out


def ref_mbconv_prepared(x, q, *, stride, use_se, identity):
    """Pure-JAX f32 reference using the same folded (bf16-quantized) weights as the kernels."""
    silu = lambda v: v * jax.nn.sigmoid(v)
    pad = lambda v: jnp.pad(v, ((0, 0), (1, 1), (1, 1), (0, 0)))
    N, H, W, Cin = x.shape
    Ho = (H - 1) // stride + 1
    Wo = (W - 1) // stride + 1
    if use_se:
        w1 = q['w_pw1'].astype(jnp.float32)
        h = silu(x.reshape(-1, Cin) @ w1 + q['b1'])
        C = h.shape[-1]
        h = h.reshape(N, H, W, C)
        xp = pad(h)
        acc = jnp.zeros((N, Ho, Wo, C), jnp.float32)
        for dy in range(3):
            for dx in range(3):
                acc = acc + xp[:, dy:dy + (Ho - 1) * stride + 1:stride,
                                  dx:dx + (Wo - 1) * stride + 1:stride, :] * q['w_dw'][dy * 3 + dx]
        h = silu(acc + q['b2'])
        m = h.mean(axis=(1, 2))
        z = silu(m @ q['se_w1'] + q['se_b1'])
        g = jax.nn.sigmoid(z @ q['se_w2'] + q['se_b2'])
        h = h * g[:, None, None, :]
        out = h.reshape(-1, C) @ q['w_pw2'].astype(jnp.float32) + q['b3']
        out = out.reshape(N, Ho, Wo, -1)
    else:
        Ch = q['w_pw2'].shape[0]
        w3 = q['w_c3'].astype(jnp.float32).reshape(9, Cin, Ch)
        xp = pad(x)
        acc = jnp.zeros((N, Ho, Wo, Ch), jnp.float32)
        for dy in range(3):
            for dx in range(3):
                tap = xp[:, dy:dy + (Ho - 1) * stride + 1:stride,
                            dx:dx + (Wo - 1) * stride + 1:stride, :]
                acc = acc + jnp.einsum('nhwc,cd->nhwd', tap, w3[dy * 3 + dx])
        h = silu(acc + q['b1'])
        out = h.reshape(-1, Ch) @ q['w_pw2'].astype(jnp.float32) + q['b2']
        out = out.reshape(N, Ho, Wo, -1)
    if identity:
        out = out + x
    return out


if __name__ == "__main__":
    key = jax.random.PRNGKey(0)
    kx, kp1, kp2 = jax.random.split(key, 3)

    # Config A: use_se=True, stride=1, in==out -> identity residual path.
    N, H, W = 2, 16, 16
    in_planes, out_planes, expand_ratio, stride = 8, 8, 4, 1      # hidden_dim = 32
    identity = (stride == 1 and in_planes == out_planes)
    x = jax.random.normal(kx, (N, H, W, in_planes), dtype=jnp.float32)
    p = init_params_se(kp1, in_planes, out_planes, expand_ratio)
    q = prepare_params_se(p)
    out_a = jax.block_until_ready(
        mbconv_v2(x, q, stride=stride, use_se=True, identity=identity))
    ref_a = ref_mbconv_prepared(x, q, stride=stride, use_se=True, identity=identity)
    raw_a = ref_mbconv(x, p, stride=stride, use_se=True, identity=identity)
    assert out_a.shape == raw_a.shape
    # Kernel vs folded-weight reference: only in-kernel bf16 activation rounding differs.
    assert jnp.allclose(out_a, ref_a, rtol=2e-2, atol=3e-2), \
        float(jnp.max(jnp.abs(out_a - ref_a)))
    # Folded/bf16 reference vs raw f32 reference: validates BN folding (absorbs weight quant).
    assert jnp.allclose(ref_a, raw_a, rtol=5e-2, atol=5e-2), \
        float(jnp.max(jnp.abs(ref_a - raw_a)))

    # Config B: use_se=False, stride=1, in != out -> no residual.
    in2, out2, exp2 = 8, 16, 2                                     # hidden_dim = 16
    p2 = init_params_nose(kp2, in2, out2, exp2)
    q2 = prepare_params_nose(p2)
    out_b = jax.block_until_ready(
        mbconv_v2(x, q2, stride=1, use_se=False, identity=False))
    ref_b = ref_mbconv_prepared(x, q2, stride=1, use_se=False, identity=False)
    raw_b = ref_mbconv(x, p2, stride=1, use_se=False, identity=False)
    assert out_b.shape == raw_b.shape
    assert jnp.allclose(out_b, ref_b, rtol=2e-2, atol=3e-2), \
        float(jnp.max(jnp.abs(out_b - ref_b)))
    assert jnp.allclose(ref_b, raw_b, rtol=5e-2, atol=5e-2), \
        float(jnp.max(jnp.abs(ref_b - raw_b)))

    print("KERNEL_OK")
</pallas_src>

<mosaic_0001>
module attributes {stable_mosaic.version = 11 : i64} {
  func.func @_conv1x1_bias_silu_kernel(%arg0: i32, %arg1: memref<512x8xf32, #tpu.memory_space<vmem>>, %arg2: memref<8x32xbf16, #tpu.memory_space<vmem>>, %arg3: memref<1x32xf32, #tpu.memory_space<vmem>>, %arg4: memref<512x32xf32, #tpu.memory_space<vmem>>) attributes {dimension_semantics = [#tpu.dimension_semantics<parallel>], iteration_bounds = array<i64: 1>, scalar_prefetch = 0 : i64, scratch_operands = 0 : i64, tpu.core_type = #tpu.core_type<tc>, window_params = [{transform_indices = @transform_0, window_bounds = array<i64: 512, 8>}, {pipeline_mode = #tpu.pipeline_mode<synchronous>, transform_indices = @transform_1, window_bounds = array<i64: 8, 32>}, {pipeline_mode = #tpu.pipeline_mode<synchronous>, transform_indices = @transform_2, window_bounds = array<i64: 1, 32>}, {transform_indices = @transform_3, window_bounds = array<i64: 512, 32>}]} {
    %c0 = arith.constant 0 : index
    %c0_0 = arith.constant 0 : index
    %0 = vector.load %arg1[%c0, %c0_0] : memref<512x8xf32, #tpu.memory_space<vmem>>, vector<512x8xf32>
    %1 = arith.truncf %0 : vector<512x8xf32> to vector<512x8xbf16>
    %c0_1 = arith.constant 0 : index
    %c0_2 = arith.constant 0 : index
    %2 = vector.load %arg2[%c0_1, %c0_2] : memref<8x32xbf16, #tpu.memory_space<vmem>>, vector<8x32xbf16>
    %cst = arith.constant dense<0.000000e+00> : vector<512x32xf32>
    %3 = tpu.matmul %1, %2, %cst {dimension_numbers = #tpu.dot_dimension_numbers<[1], [0], [0], [1], [0, 0, 1, 1], [], []>} : vector<512x8xbf16>, vector<8x32xbf16>, vector<512x32xf32> -> vector<512x32xf32>
    %c0_3 = arith.constant 0 : index
    %c0_4 = arith.constant 0 : index
    %4 = vector.load %arg3[%c0_3, %c0_4] : memref<1x32xf32, #tpu.memory_space<vmem>>, vector<1x32xf32>
    %5 = vector.broadcast %4 : vector<1x32xf32> to vector<512x32xf32>
    %6 = arith.addf %3, %5 : vector<512x32xf32>
    %7 = arith.negf %6 : vector<512x32xf32>
    %8 = math.exp %7 : vector<512x32xf32>
    %cst_5 = arith.constant 1.000000e+00 : f32
    %9 = vector.broadcast %cst_5 : f32 to vector<512x32xf32>
    %10 = arith.addf %9, %8 : vector<512x32xf32>
    %11 = arith.divf %9, %10 : vector<512x32xf32>
    %12 = arith.mulf %6, %11 : vector<512x32xf32>
    %c0_6 = arith.constant 0 : index
    %c0_7 = arith.constant 0 : index
    %13 = vector.load %arg4[%c0_6, %c0_7] : memref<512x32xf32, #tpu.memory_space<vmem>>, vector<512x32xf32>
    tpu.vector_store %arg4[%c0_6, %c0_7], %12 {strides = array<i32>} : memref<512x32xf32, #tpu.memory_space<vmem>>, vector<512x32xf32>,
    return
  }
  func.func @transform_0(%arg0: i32) -> (i32, i32) {
    %c0_i32 = arith.constant 0 : i32
    %c0_i32_0 = arith.constant 0 : i32
    return %arg0, %c0_i32 : i32, i32
  }
  func.func @transform_1(%arg0: i32) -> (i32, i32) {
    %c0_i32 = arith.constant 0 : i32
    %c0_i32_0 = arith.constant 0 : i32
    %c0_i32_1 = arith.constant 0 : i32
    return %c0_i32, %c0_i32_0 : i32, i32
  }
  func.func @transform_2(%arg0: i32) -> (i32, i32) {
    %c0_i32 = arith.constant 0 : i32
    %c0_i32_0 = arith.constant 0 : i32
    %c0_i32_1 = arith.constant 0 : i32
    return %c0_i32, %c0_i32_0 : i32, i32
  }
  func.func @transform_3(%arg0: i32) -> (i32, i32) {
    %c0_i32 = arith.constant 0 : i32
    %c0_i32_0 = arith.constant 0 : i32
    return %arg0, %c0_i32 : i32, i32
  }
}

</mosaic_0001>

<bundles_post_ra>
// kernel: tpu_custom_call.1
= control target key start
LH: loop header
LB: loop body
LE: loop exit
PB: predicated region body
PF: predicated region fallthrough
CT: control target
= control target key end

     0   :  { %vm216_vm0 = vcmask 1043456   ;;  %vm119_vm1 = vcmask 64512   ;;  %vm957_vm2 = vcmask 261120   ;;  %s2379_s1 = inlined_call_operand.vmem [shape: bf16[8,32], index: 1, kind: input, shape index: {}]   ;;  %s2380_s0 = inlined_call_operand.vmem [shape: f32[512,8], index: 0, kind: input, shape index: {}]   ;;  %s2381_s2 = inlined_call_operand.vmem [shape: f32[1,32], index: 2, kind: input, shape index: {}]   ;;  %s2382_s3 = inlined_call_operand.vmem [shape: f32[512,32], index: 3, kind: output, shape index: {}]  }
   0x1   :  { %v111_v0 = vld [vmem:[%s2379_s1] sm:$0xf]  ;;  %v16_v2 = vld [vmem:[%s2380_s0 + $0x8] sm:$0xff]  ;;  %v17_v7 = vld [vmem:[%s2380_s0 + $0x10] sm:$0xff] }
   0x2   :  { %v15_v1 = vld [vmem:[%s2380_s0] sm:$0xff]  ;;  %1224 = vmatprep.subr.msk.bf16.mxu0 %vm216_vm0, %v111_v0  ;;  %1225 = vmatprep.subr.msk.bf16.mxu1 %vm216_vm0, %v111_v0  ;;  %v218_v3 = vsel %vm216_vm0, %v111_v0, 0  ;;  %v48_v6 = vld [vmem:[%s2380_s0 + $0x108] sm:$0xff]  ;;  %v18_v9 = vld [vmem:[%s2380_s0 + $0x18] sm:$0xff] }
   0x3   :  { %v79_v4 = vpack.c.bf16 %v16_v2, %v15_v1  ;;  %v47_v5 = vld [vmem:[%s2380_s0 + $0x100] sm:$0xff]  ;;  %1157 = vmatpush3.bf16.msra.mxu0 %v218_v3  ;;  %1223 = vmatpush3.bf16.msra.mxu1 %v218_v3  ;;  %v49_v10 = vld [vmem:[%s2380_s0 + $0x110] sm:$0xff]  ;;  %v50_v11 = vld [vmem:[%s2380_s0 + $0x118] sm:$0xff]  ;;  %v80_v12 = vpack.c.bf16 %v18_v9, %v17_v7 }
   0x4   :  { %v95_v8 = vpack.c.bf16 %v48_v6, %v47_v5  ;;  %v96_v13 = vpack.c.bf16 %v50_v11, %v49_v10  ;;  %v19_v14 = vld [vmem:[%s2380_s0 + $0x20] sm:$0xff]  ;;  %v20_v15 = vld [vmem:[%s2380_s0 + $0x28] sm:$0xff]  ;;  %v21_v20 = vld [vmem:[%s2380_s0 + $0x30] sm:$0xff] }
   0x5   :  { %1158 = vmatprep.mubr.msk.bf16.mxu0 %vm119_vm1, %v79_v4  ;;  %v51_v16 = vld [vmem:[%s2380_s0 + $0x120] sm:$0xff]  ;;  %v81_v17 = vpack.c.bf16 %v20_v15, %v19_v14  ;;  %v52_v18 = vld [vmem:[%s2380_s0 + $0x128] sm:$0xff]  ;;  %v22_v21 = vld [vmem:[%s2380_s0 + $0x38] sm:$0xff] }
   0x6   :  { %1190 = vmatprep.mubr.msk.bf16.mxu1 %vm119_vm1, %v95_v8  ;;  %1159 = vmatmul.mubr.msk.bf16.vlgmr.msra.gmra.mrb[0].mxu0 %vm119_vm1, %v80_v12  ;;  %v97_v19 = vpack.c.bf16 %v52_v18, %v51_v16  ;;  %v53_v22 = vld [vmem:[%s2380_s0 + $0x130] sm:$0xff]  ;;  %v54_v23 = vld [vmem:[%s2380_s0 + $0x138] sm:$0xff]  ;;  %v23_v24 = vld [vmem:[%s2380_s0 + $0x40] sm:$0xff]  ;;  %v82_v28 = vpack.c.bf16 %v22_v21, %v21_v20 }
   0x7   :  { %1191 = vmatmul.mubr.msk.bf16.vlgmr.msra.gmra.mrb[0].mxu1 %vm119_vm1, %v96_v13  ;;  %1162 = vmatprep.mubr.msk.bf16.mxu0 %vm119_vm1, %v81_v17  ;;  %v24_v25 = vld [vmem:[%s2380_s0 + $0x48] sm:$0xff]  ;;  %v55_v26 = vld [vmem:[%s2380_s0 + $0x140] sm:$0xff]  ;;  %v98_v29 = vpack.c.bf16 %v54_v23, %v53_v22  ;;  %v25_v32 = vld [vmem:[%s2380_s0 + $0x50] sm:$0xff] }
   0x8   :  { %1194 = vmatprep.mubr.msk.bf16.mxu1 %vm119_vm1, %v97_v19  ;;  %v56_v27 = vld [vmem:[%s2380_s0 + $0x148] sm:$0xff]  ;;  %v83_v30 = vpack.c.bf16 %v24_v25, %v23_v24  ;;  %v26_v33 = vld [vmem:[%s2380_s0 + $0x58] sm:$0xff]  ;;  %v57_v34 = vld [vmem:[%s2380_s0 + $0x150] sm:$0xff] }
   0x9   :  { %v99_v31 = vpack.c.bf16 %v56_v27, %v55_v26  ;;  %v58_v35 = vld [vmem:[%s2380_s0 + $0x158] sm:$0xff]  ;;  %v27_v36 = vld [vmem:[%s2380_s0 + $0x60] sm:$0xff]  ;;  %v28_v37 = vld [vmem:[%s2380_s0 + $0x68] sm:$0xff]  ;;  %v84_v40 = vpack.c.bf16 %v26_v33, %v25_v32 }
   0xa   :  { %v59_v38 = vld [vmem:[%s2380_s0 + $0x160] sm:$0xff]  ;;  %v60_v39 = vld [vmem:[%s2380_s0 + $0x168] sm:$0xff]  ;;  %v100_v41 = vpack.c.bf16 %v58_v35, %v57_v34  ;;  %v85_v42 = vpack.c.bf16 %v28_v37, %v27_v36  ;;  %v29_v44 = vld [vmem:[%s2380_s0 + $0x70] sm:$0xff] }
   0xb   :  { %v101_v43 = vpack.c.bf16 %v60_v39, %v59_v38  ;;  %v30_v45 = vld [vmem:[%s2380_s0 + $0x78] sm:$0xff]  ;;  %v61_v46 = vld [vmem:[%s2380_s0 + $0x170] sm:$0xff]  ;;  %v31_v48 = vld [vmem:[%s2380_s0 + $0x80] sm:$0xff] }
   0xc   :  { %v62_v47 = vld [vmem:[%s2380_s0 + $0x178] sm:$0xff]  ;;  %v32_v49 = vld [vmem:[%s2380_s0 + $0x88] sm:$0xff]  ;;  %v63_v50 = vld [vmem:[%s2380_s0 + $0x180] sm:$0xff]  ;;  %v86_v52 = vpack.c.bf16 %v30_v45, %v29_v44 }
   0xd   :  { %v64_v51 = vld [vmem:[%s2380_s0 + $0x188] sm:$0xff]  ;;  %v102_v53 = vpack.c.bf16 %v62_v47, %v61_v46  ;;  %v87_v54 = vpack.c.bf16 %v32_v49, %v31_v48  ;;  %v33_v56 = vld [vmem:[%s2380_s0 + $0x90] sm:$0xff]  ;;  %v34_v57 = vld [vmem:[%s2380_s0 + $0x98] sm:$0xff] }
   0xe   :  { %1163 = vmatmul.mubr.msk.bf16.gmra.mrb[4].mxu0 %vm119_vm1, %v82_v28  ;;  %v103_v55 = vpack.c.bf16 %v64_v51, %v63_v50  ;;  %v65_v58 = vld [vmem:[%s2380_s0 + $0x190] sm:$0xff]  ;;  %v66_v59 = vld [vmem:[%s2380_s0 + $0x198] sm:$0xff]  ;;  %v35_v60 = vld [vmem:[%s2380_s0 + $0xa0] sm:$0xff]  ;;  %v88_v0 = vpack.c.bf16 %v34_v57, %v33_v56 }
   0xf   :  { %1195 = vmatmul.mubr.msk.bf16.gmra.mrb[4].mxu1 %vm119_vm1, %v98_v29  ;;  %1166 = vmatprep.mubr.msk.bf16.mxu0 %vm119_vm1, %v83_v30  ;;  %v36_v61 = vld [vmem:[%s2380_s0 + $0xa8] sm:$0xff]  ;;  %v67_v62 = vld [vmem:[%s2380_s0 + $0x1a0] sm:$0xff]  ;;  %v104_v1 = vpack.c.bf16 %v66_v59, %v65_v58  ;;  %v37_v4 = vld [vmem:[%s2380_s0 + $0xb0] sm:$0xff] }
  0x10   :  { %1198 = vmatprep.mubr.msk.bf16.mxu1 %vm119_vm1, %v99_v31  ;;  %v68_v63 = vld [vmem:[%s2380_s0 + $0x1a8] sm:$0xff]  ;;  %v89_v2 = vpack.c.bf16 %v36_v61, %v35_v60  ;;  %v38_v5 = vld [vmem:[%s2380_s0 + $0xb8] sm:$0xff]  ;;  %v69_v6 = vld [vmem:[%s2380_s0 + $0x1b0] sm:$0xff] }
  0x11   :  { %v105_v3 = vpack.c.bf16 %v68_v63, %v67_v62  ;;  %v70_v7 = vld [vmem:[%s2380_s0 + $0x1b8] sm:$0xff]  ;;  %v39_v8 = vld [vmem:[%s2380_s0 + $0xc0] sm:$0xff]  ;;  %v40_v9 = vld [vmem:[%s2380_s0 + $0xc8] sm:$0xff]  ;;  %v90_v12 = vpack.c.bf16 %v38_v5, %v37_v4 }
  0x12   :  { %v71_v10 = vld [vmem:[%s2380_s0 + $0x1c0] sm:$0xff]  ;;  %v72_v11 = vld [vmem:[%s2380_s0 + $0x1c8] sm:$0xff]  ;;  %v106_v13 = vpack.c.bf16 %v70_v7, %v69_v6  ;;  %v91_v14 = vpack.c.bf16 %v40_v9, %v39_v8  ;;  %v41_v16 = vld [vmem:[%s2380_s0 + $0xd0] sm:$0xff] }
  0x13   :  { %v107_v15 = vpack.c.bf16 %v72_v11, %v71_v10  ;;  %v42_v17 = vld [vmem:[%s2380_s0 + $0xd8] sm:$0xff]  ;;  %v73_v18 = vld [vmem:[%s2380_s0 + $0x1d0] sm:$0xff]  ;;  %v43_v20 = vld [vmem:[%s2380_s0 + $0xe0] sm:$0xff] }
  0x14   :  { %v74_v19 = vld [vmem:[%s2380_s0 + $0x1d8] sm:$0xff]  ;;  %v44_v21 = vld [vmem:[%s2380_s0 + $0xe8] sm:$0xff]  ;;  %v75_v22 = vld [vmem:[%s2380_s0 + $0x1e0] sm:$0xff]  ;;  %v92_v24 = vpack.c.bf16 %v42_v17, %v41_v16 }
  0x15   :  { %v76_v23 = vld [vmem:[%s2380_s0 + $0x1e8] sm:$0xff]  ;;  %v108_v25 = vpack.c.bf16 %v74_v19, %v73_v18  ;;  %v93_v26 = vpack.c.bf16 %v44_v21, %v43_v20  ;;  %v45_v28 = vld [vmem:[%s2380_s0 + $0xf0] sm:$0xff]  ;;  %v46_v29 = vld [vmem:[%s2380_s0 + $0xf8] sm:$0xff] }
  0x16   :  { %1167 = vmatmul.mubr.msk.bf16.gmra.mrb[8].mxu0 %vm119_vm1, %v84_v40  ;;  %v109_v27 = vpack.c.bf16 %v76_v23, %v75_v22  ;;  %v77_v30 = vld [vmem:[%s2380_s0 + $0x1f0] sm:$0xff]  ;;  %v78_v31 = vld [vmem:[%s2380_s0 + $0x1f8] sm:$0xff]  ;;  %v94_v32 = vpack.c.bf16 %v46_v29, %v45_v28  ;;  %v1732_v34 = vld [vmem:[%s2381_s2] ss:$0 sm:$0xff] }
  0x17   :  { %1199 = vmatmul.mubr.msk.bf16.gmra.mrb[8].mxu1 %vm119_vm1, %v100_v41  ;;  %1170 = vmatprep.mubr.msk.bf16.mxu0 %vm119_vm1, %v85_v42  ;;  %v110_v33 = vpack.c.bf16 %v78_v31, %v77_v30 }
  0x18   :  { %1202 = vmatprep.mubr.msk.bf16.mxu1 %vm119_vm1, %v101_v43 }
  0x1e   :  { %1171 = vmatmul.mubr.msk.bf16.gmra.mrb[12].mxu0 %vm119_vm1, %v86_v52 }
  0x1f   :  { %1203 = vmatmul.mubr.msk.bf16.gmra.mrb[12].mxu1 %vm119_vm1, %v102_v53  ;;  %1174 = vmatprep.mubr.msk.bf16.mxu0 %vm119_vm1, %v87_v54 }
  0x20   :  { %1206 = vmatprep.mubr.msk.bf16.mxu1 %vm119_vm1, %v103_v55 }
  0x26   :  { %1175 = vmatmul.mubr.msk.bf16.gmra.mrb[16].mxu0 %vm119_vm1, %v88_v0 }
  0x27   :  { %1207 = vmatmul.mubr.msk.bf16.gmra.mrb[16].mxu1 %vm119_vm1, %v104_v1  ;;  %1178 = vmatprep.mubr.msk.bf16.mxu0 %vm119_vm1, %v89_v2 }
  0x28   :  { %1210 = vmatprep.mubr.msk.bf16.mxu1 %vm119_vm1, %v105_v3 }
  0x2e   :  { %1179 = vmatmul.mubr.msk.bf16.gmra.mrb[20].mxu0 %vm119_vm1, %v90_v12 }
  0x2f   :  { %1211 = vmatmul.mubr.msk.bf16.gmra.mrb[20].mxu1 %vm119_vm1, %v106_v13  ;;  %1182 = vmatprep.mubr.msk.bf16.mxu0 %vm119_vm1, %v91_v14 }
  0x30   :  { %1214 = vmatprep.mubr.msk.bf16.mxu1 %vm119_vm1, %v107_v15 }
  0x36   :  { %1183 = vmatmul.mubr.msk.bf16.gmra.mrb[24].mxu0 %vm119_vm1, %v92_v24 }
  0x37   :  { %1215 = vmatmul.mubr.msk.bf16.gmra.mrb[24].mxu1 %vm119_vm1, %v108_v25  ;;  %1186 = vmatprep.mubr.msk.bf16.mxu0 %vm119_vm1, %v93_v26 }
  0x38   :  { %1218 = vmatprep.mubr.msk.bf16.mxu1 %vm119_vm1, %v109_v27 }
  0x3e   :  { %1187 = vmatmul.mubr.msk.bf16.gmra.mrb[28].mxu0 %vm119_vm1, %v94_v32 }
  0x3f   :  { %1219 = vmatmul.mubr.msk.bf16.gmra.mrb[28].mxu1 %vm119_vm1, %v110_v33 }
  0xd9   :  { %v1160_v35 = vpop.f32.mrb[0].mxu0 }
  0xda   :  { %v1192_v36 = vpop.f32.mrb[0].mxu1  ;;  %v1735_v37 = vadd.f32 %v1160_v35, %v1732_v34  ;;  %v254_v39 = vpop.f32.mrb[1].mxu0 }
  0xdb   :  { %v1738_v38 = vadd.f32 %v1192_v36, %v1732_v34  ;;  %v382_v40 = vpop.f32.mrb[1].mxu1  ;;  %v1741_v41 = vadd.f32 %v1732_v34, %v254_v39  ;;  %v1161_v43 = vpop.f32.mrb[2].mxu0 }
  0xdc   :  { %v1744_v42 = vadd.f32 %v1732_v34, %v382_v40  ;;  %v1193_v44 = vpop.f32.mrb[2].mxu1  ;;  %v1061_v45 = vmul.f32 -1.442695, %v1735_v37  ;;  %v1749_v47 = vadd.f32 %v1161_v43, %v1732_v34  ;;  %v257_v49 = vpop.f32.mrb[3].mxu0 }
  0xdd   :  { %v1093_v46 = vmul.f32 -1.442695, %v1738_v38  ;;  %v1752_v48 = vadd.f32 %v1193_v44, %v1732_v34  ;;  %v385_v50 = vpop.f32.mrb[3].mxu1  ;;  %v1059_v51 = vmul.f32 -1.442695, %v1741_v41  ;;  %v1757_v53 = vadd.f32 %v1732_v34, %v257_v49 }
  0xde   :  { %v1091_v52 = vmul.f32 -1.442695, %v1744_v42  ;;  %v1760_v54 = vadd.f32 %v1732_v34, %v385_v50  ;;  %1226 = vpow2.f32 %v1061_v45  ;;  %v1062_v55 = vmul.f32 -1.442695, %v1749_v47 }
  0xdf   :  { %1228 = vpow2.f32 %v1093_v46  ;;  %v1094_v56 = vmul.f32 -1.442695, %v1752_v48  ;;  %v1060_v57 = vmul.f32 -1.442695, %v1757_v53 }
  0xe0   :  { %1230 = vpow2.f32 %v1059_v51  ;;  %v1092_v58 = vmul.f32 -1.442695, %v1760_v54 }
  0xe1   :  { %1232 = vpow2.f32 %v1091_v52  ;;  %v1164_v59 = vpop.f32.mrb[4].mxu0 }
  0xe2   :  { %v1196_v60 = vpop.f32.mrb[4].mxu1  ;;  %1234 = vpow2.f32 %v1062_v55  ;;  %v1767_v61 = vadd.f32 %v1164_v59, %v1732_v34  ;;  %v270_v63 = vpop.f32.mrb[5].mxu0 }
  0xe3   :  { %v1770_v62 = vadd.f32 %v1196_v60, %v1732_v34  ;;  %v398_v0 = vpop.f32.mrb[5].mxu1  ;;  %1236 = vpow2.f32 %v1094_v56  ;;  %v1773_v1 = vadd.f32 %v1732_v34, %v270_v63  ;;  %v1165_v3 = vpop.f32.mrb[6].mxu0 }
  0xe4   :  { %v1776_v2 = vadd.f32 %v1732_v34, %v398_v0  ;;  %v1197_v4 = vpop.f32.mrb[6].mxu1  ;;  %1238 = vpow2.f32 %v1060_v57  ;;  %v1065_v5 = vmul.f32 -1.442695, %v1767_v61  ;;  %v1781_v7 = vadd.f32 %v1165_v3, %v1732_v34  ;;  %v273_v8 = vpop.f32.mrb[7].mxu0 }
  0xe5   :  { %v1097_v6 = vmul.f32 -1.442695, %v1770_v62  ;;  %v401_v9 = vpop.f32.mrb[7].mxu1  ;;  %1240 = vpow2.f32 %v1092_v58  ;;  %v1063_v10 = vmul.f32 -1.442695, %v1773_v1  ;;  %v1793_v43 = vadd.f32 %v1197_v4, %v1732_v34 }
  0xe6   :  { %v1095_v11 = vmul.f32 -1.442695, %v1776_v2  ;;  %1242 = vpow2.f32 %v1065_v5  ;;  %v1066_v12 = vmul.f32 -1.442695, %v1781_v7  ;;  %v1796_v46 = vadd.f32 %v1732_v34, %v273_v8 }
  0xe7   :  { %1244 = vpow2.f32 %v1097_v6  ;;  %v1801_v52 = vadd.f32 %v1732_v34, %v401_v9  ;;  %v1098_v4 = vmul.f32 -1.442695, %v1793_v43 }
  0xe8   :  { %v1227_v13 = vpop.eup %1226  ;;  %1246 = vpow2.f32 %v1063_v10 }
  0xe9   :  { %v1229_v14 = vpop.eup %1228  ;;  %v703_v15 = vadd.f32 1.0, %v1227_v13  ;;  %1248 = vpow2.f32 %v1095_v11  ;;  %v1168_v16 = vpop.f32.mrb[8].mxu0  ;;  %v1064_v11 = vmul.f32 -1.442695, %v1796_v46 }
  0xea   :  { %v1200_v17 = vpop.f32.mrb[8].mxu1  ;;  %v1231_v18 = vpop.eup %1230  ;;  %v735_v19 = vadd.f32 1.0, %v1229_v14  ;;  %1250 = vpow2.f32 %v1066_v12  ;;  %v1808_v59 = vadd.f32 %v1168_v16, %v1732_v34  ;;  %v1096_v16 = vmul.f32 -1.442695, %v1801_v52 }
  0xeb   :  { %v286_v20 = vpop.f32.mrb[9].mxu0  ;;  %v414_v21 = vpop.f32.mrb[9].mxu1  ;;  %1252 = vrcp.f32 %v703_v15  ;;  %v701_v23 = vadd.f32 1.0, %v1231_v18  ;;  %v1816_v5 = vadd.f32 %v1200_v17, %v1732_v34 }
  0xec   :  { %v1233_v22 = vpop.eup %1232  ;;  %v1169_v24 = vpop.f32.mrb[10].mxu0  ;;  %1254 = vrcp.f32 %v735_v19  ;;  %v1824_v12 = vadd.f32 %v1732_v34, %v286_v20  ;;  %v1831_v17 = vadd.f32 %v1732_v34, %v414_v21 }
  0xed   :  { %v1786_v25 = vpop.f32.mrb[10].mxu1  ;;  %v1235_v26 = vpop.eup %1234  ;;  %v733_v27 = vadd.f32 1.0, %v1233_v22  ;;  %1256 = vrcp.f32 %v701_v23  ;;  %v1069_v22 = vmul.f32 -1.442695, %v1808_v59  ;;  %v1836_v20 = vadd.f32 %v1169_v24, %v1732_v34 }
  0xee   :  { %v1788_v28 = vpop.f32.mrb[11].mxu0  ;;  %v1237_v29 = vpop.eup %1236  ;;  %v704_v30 = vadd.f32 1.0, %v1235_v26  ;;  %v1101_v21 = vmul.f32 -1.442695, %v1816_v5 }
  0xef   :  { %v1790_v31 = vpop.f32.mrb[11].mxu1  ;;  %v1239_v32 = vpop.eup %1238  ;;  %1258 = vrcp.f32 %v733_v27  ;;  %v736_v33 = vadd.f32 1.0, %v1237_v29  ;;  %v1067_v27 = vmul.f32 -1.442695, %v1824_v12 }
  0xf0   :  { %v1241_v35 = vpop.eup %1240  ;;  %1260 = vrcp.f32 %v704_v30  ;;  %v702_v36 = vadd.f32 1.0, %v1239_v32 }
  0xf1   :  { %v1243_v39 = vpop.eup %1242  ;;  %1262 = vrcp.f32 %v736_v33  ;;  %v734_v40 = vadd.f32 1.0, %v1241_v35  ;;  %v1798_v49 = vpop.f32.mrb[12].mxu0  ;;  %v1870_v33 = vadd.f32 %v1732_v34, %v1790_v31 }
  0xf2   :  { %v1245_v44 = vpop.eup %1244  ;;  %1264 = vrcp.f32 %v702_v36  ;;  %v707_v45 = vadd.f32 1.0, %v1243_v39  ;;  %v1803_v55 = vpop.f32.mrb[12].mxu1 }
  0xf3   :  { %v1247_v50 = vpop.eup %1246  ;;  %1266 = vrcp.f32 %v734_v40  ;;  %v739_v51 = vadd.f32 1.0, %v1245_v44  ;;  %v1805_v56 = vpop.f32.mrb[13].mxu0  ;;  %v1884_v40 = vadd.f32 %v1798_v49, %v1732_v34 }
  0xf4   :  { %v1249_v57 = vpop.eup %1248  ;;  %1268 = vrcp.f32 %v707_v45  ;;  %v705_v58 = vadd.f32 1.0, %v1247_v50  ;;  %v1810_v60 = vpop.f32.mrb[13].mxu1 }
  0xf5   :  { %v1812_v63 = vpop.f32.mrb[14].mxu0  ;;  %v1251_v0 = vpop.eup %1250  ;;  %1270 = vrcp.f32 %v739_v51  ;;  %v737_v3 = vadd.f32 1.0, %v1249_v57  ;;  %v1898_v51 = vadd.f32 %v1803_v55, %v1732_v34 }
  0xf6   :  { %v1818_v6 = vpop.f32.mrb[14].mxu1  ;;  %v1820_v8 = vpop.f32.mrb[15].mxu0  ;;  %1272 = vrcp.f32 %v705_v58  ;;  %v708_v10 = vadd.f32 1.0, %v1251_v0 }
  0xf7   :  { %v1253_v9 = vpop.eup %1252  ;;  %v1826_v13 = vpop.f32.mrb[15].mxu1  ;;  %1274 = vrcp.f32 %v737_v3 }
  0xf8   :  { %v1255_v14 = vpop.eup %1254  ;;  %v895_v15 = vmul.f32 %v1253_v9, %v1735_v37  ;;  %1276 = vrcp.f32 %v708_v10  ;;  %v1914_v9 = vadd.f32 %v1732_v34, %v1805_v56 }
  0xf9   :  { %v1257_v18 = vpop.eup %1256  ;;  %v927_v19 = vmul.f32 %v1255_v14, %v1738_v38  ;;  %1278 = vpow2.f32 %v1098_v4  ;;  %v1846_v38 = vadd.f32 %v1786_v25, %v1732_v34  ;;  %v1858_v29 = vpop.f32.mrb[16].mxu0  ;;  %v1100_v4 = vmul.f32 -1.442695, %v1870_v33 }
  0xfa   :  { %v1259_v23 = vpop.eup %1258  ;;  %960 = vst.msk [vmem:[%s2382_s3 + $0x10] sm:$0xff] %vm957_vm2, %v895_v15  ;;  %v893_v37 = vmul.f32 %v1257_v18, %v1741_v41  ;;  %1280 = vpow2.f32 %v1064_v11  ;;  %v1856_v41 = vadd.f32 %v1732_v34, %v1788_v28  ;;  %v1860_v30 = vpop.f32.mrb[16].mxu1  ;;  %v1073_v11 = vmul.f32 -1.442695, %v1884_v40 }
  0xfb   :  { %v1261_v26 = vpop.eup %1260  ;;  %992 = vst.msk [vmem:[%s2382_s3 + $0x110] sm:$0xff] %vm957_vm2, %v927_v19  ;;  %v925_v24 = vmul.f32 %v1259_v23, %v1744_v42  ;;  %1282 = vpow2.f32 %v1096_v16  ;;  %v1099_v42 = vmul.f32 -1.442695, %v1831_v17  ;;  %v1872_v28 = vpop.f32.mrb[17].mxu0  ;;  %v1105_v15 = vmul.f32 -1.442695, %v1898_v51 }
  0xfc   :  { %v1263_v25 = vpop.eup %1262  ;;  %958 = vst.msk [vmem:[%s2382_s3] sm:$0xff] %vm957_vm2, %v893_v37  ;;  %v896_v32 = vmul.f32 %v1261_v26, %v1749_v47  ;;  %v1874_v35 = vpop.f32.mrb[17].mxu1  ;;  %1284 = vpow2.f32 %v1069_v22  ;;  %v1070_v47 = vmul.f32 -1.442695, %v1836_v20  ;;  %v1941_v19 = vadd.f32 %v1732_v34, %v1810_v60 }
  0xfd   :  { %v1265_v36 = vpop.eup %1264  ;;  %990 = vst.msk [vmem:[%s2382_s3 + $0x100] sm:$0xff] %vm957_vm2, %v925_v24  ;;  %v928_v39 = vmul.f32 %v1263_v25, %v1752_v48  ;;  %v1886_v31 = vpop.f32.mrb[18].mxu0  ;;  %1286 = vpow2.f32 %v1101_v21  ;;  %v1102_v48 = vmul.f32 -1.442695, %v1846_v38 }
  0xfe   :  { %v1888_v44 = vpop.f32.mrb[18].mxu1  ;;  %v1267_v45 = vpop.eup %1266  ;;  %961 = vst.msk [vmem:[%s2382_s3 + $0x18] sm:$0xff] %vm957_vm2, %v896_v32  ;;  %v894_v50 = vmul.f32 %v1265_v36, %v1757_v53  ;;  %1288 = vpow2.f32 %v1067_v27  ;;  %v1068_v53 = vmul.f32 -1.442695, %v1856_v41 }
  0xff   :  { %v321_v49 = vpop.f32.mrb[19].mxu0  ;;  %v449_v57 = vpop.f32.mrb[19].mxu1  ;;  %993 = vst.msk [vmem:[%s2382_s3 + $0x118] sm:$0xff] %vm957_vm2, %v928_v39  ;;  %v926_v0 = vmul.f32 %v1267_v45, %v1760_v54  ;;  %1290 = vpow2.f32 %v1099_v42  ;;  %v1966_v39 = vmul.f32 -1.442695, %v1914_v9 }
 0x100   :  { %v1269_v58 = vpop.eup %1268  ;;  %959 = vst.msk [vmem:[%s2382_s3 + $0x8] sm:$0xff] %vm957_vm2, %v894_v50  ;;  %1292 = vpow2.f32 %v1070_v47  ;;  %v1932_v16 = vadd.f32 %v1732_v34, %v449_v57  ;;  %v1972_v57 = vmul.f32 -1.442695, %v1941_v19 }
 0x101   :  { %v1271_v3 = vpop.eup %1270  ;;  %v899_v55 = vmul.f32 %v1269_v58, %v1767_v61  ;;  %991 = vst.msk [vmem:[%s2382_s3 + $0x108] sm:$0xff] %vm957_vm2, %v926_v0  ;;  %v1923_v61 = vadd.f32 %v1732_v34, %v321_v49  ;;  %1294 = vpow2.f32 %v1102_v48  ;;  %v1976_v58 = vadd.f32 %v1812_v63, %v1732_v34 }
 0x102   :  { %v1273_v10 = vpop.eup %1272  ;;  %v931_v54 = vmul.f32 %v1271_v3, %v1770_v62  ;;  %1296 = vpow2.f32 %v1068_v53  ;;  %v1212_v22 = vpop.f32.mrb[20].mxu1  ;;  %v1980_v3 = vadd.f32 %v1818_v6, %v1732_v34 }
 0x103   :  { %v1275_v14 = vpop.eup %1274  ;;  %964 = vst.msk [vmem:[%s2382_s3 + $0x30] sm:$0xff] %vm957_vm2, %v899_v55  ;;  %v897_v56 = vmul.f32 %v1273_v10, %v1773_v1  ;;  %v1180_v1 = vpop.f32.mrb[20].mxu0  ;;  %1298 = vpow2.f32 %v1100_v4  ;;  %v1956_v27 = vadd.f32 %v1212_v22, %v1732_v34 }
 0x104   :  { %v1277_v62 = vpop.eup %1276  ;;  %996 = vst.msk [vmem:[%s2382_s3 + $0x130] sm:$0xff] %vm957_vm2, %v931_v54  ;;  %v929_v18 = vmul.f32 %v1275_v14, %v1776_v2  ;;  %v1949_v21 = vadd.f32 %v1180_v1, %v1732_v34  ;;  %v334_v2 = vpop.f32.mrb[21].mxu0  ;;  %1300 = vpow2.f32 %v1073_v11  ;;  %v2003_v1 = vadd.f32 %v1732_v34, %v1826_v13 }
 0x105   :  { %v1279_v23 = vpop.eup %1278  ;;  %962 = vst.msk [vmem:[%s2382_s3 + $0x20] sm:$0xff] %vm957_vm2, %v897_v56  ;;  %v900_v37 = vmul.f32 %v1277_v62, %v1781_v7  ;;  %v462_v26 = vpop.f32.mrb[21].mxu1  ;;  %v1959_v25 = vadd.f32 %v1732_v34, %v334_v2  ;;  %1302 = vpow2.f32 %v1105_v15  ;;  %v1993_v56 = vadd.f32 %v1732_v34, %v1820_v8 }
 0x106   :  { %v1281_v24 = vpop.eup %1280  ;;  %994 = vst.msk [vmem:[%s2382_s3 + $0x120] sm:$0xff] %vm957_vm2, %v929_v18  ;;  %v740_v60 = vadd.f32 1.0, %v1279_v23  ;;  %v1181_v7 = vpop.f32.mrb[22].mxu0  ;;  %v1969_v47 = vadd.f32 %v1732_v34, %v462_v26  ;;  %v1999_v18 = vmul.f32 -1.442695, %v1976_v58 }
 0x107   :  { %v1213_v32 = vpop.f32.mrb[22].mxu1  ;;  %v1283_v42 = vpop.eup %1282  ;;  %965 = vst.msk [vmem:[%s2382_s3 + $0x38] sm:$0xff] %vm957_vm2, %v900_v37  ;;  %v706_v36 = vadd.f32 1.0, %v1281_v24  ;;  %v1983_v55 = vadd.f32 %v1181_v7, %v1732_v34  ;;  %v2006_v8 = vmul.f32 -1.442695, %v1980_v3 }
 0x108   :  { %v337_v45 = vpop.f32.mrb[23].mxu0  ;;  %v465_v50 = vpop.f32.mrb[23].mxu1  ;;  %1304 = vrcp.f32 %v740_v60  ;;  %v738_v49 = vadd.f32 1.0, %v1283_v42  ;;  %v1986_v54 = vadd.f32 %v1213_v32, %v1732_v34 }
 0x109   :  { %v1285_v48 = vpop.eup %1284  ;;  %1306 = vrcp.f32 %v706_v36  ;;  %v1989_v11 = vadd.f32 %v1732_v34, %v337_v45  ;;  %v1996_v6 = vadd.f32 %v1732_v34, %v465_v50  ;;  %v1184_v22 = vpop.f32.mrb[24].mxu0 }
 0x10a   :  { %v1287_v0 = vpop.eup %1286  ;;  %v711_v53 = vadd.f32 1.0, %v1285_v48  ;;  %1308 = vrcp.f32 %v738_v49  ;;  %v2009_v2 = vadd.f32 %v1184_v22, %v1732_v34  ;;  %v1216_v26 = vpop.f32.mrb[24].mxu1  ;;  %v2018_v48 = vmul.f32 -1.442695, %v1993_v56 }
 0x10b   :  { %v1289_v4 = vpop.eup %1288  ;;  %v743_v10 = vadd.f32 1.0, %v1287_v0  ;;  %v350_v24 = vpop.f32.mrb[25].mxu0  ;;  %v2012_v32 = vadd.f32 %v1216_v26, %v1732_v34 }
 0x10c   :  { %v1291_v63 = vpop.eup %1290  ;;  %1310 = vrcp.f32 %v711_v53  ;;  %v709_v14 = vadd.f32 1.0, %v1289_v4  ;;  %v2015_v13 = vadd.f32 %v1732_v34, %v350_v24  ;;  %v478_v42 = vpop.f32.mrb[25].mxu1 }
 0x10d   :  { %v1293_v15 = vpop.eup %1292  ;;  %1312 = vrcp.f32 %v743_v10  ;;  %v741_v62 = vadd.f32 1.0, %v1291_v63  ;;  %v1185_v36 = vpop.f32.mrb[26].mxu0  ;;  %v2021_v49 = vadd.f32 %v1732_v34, %v478_v42  ;;  %v2024_v63 = vmul.f32 -1.442695, %v2003_v1 }
 0x10e   :  { %v1295_v23 = vpop.eup %1294  ;;  %1314 = vrcp.f32 %v709_v14  ;;  %v712_v37 = vadd.f32 1.0, %v1293_v15  ;;  %v1217_v0 = vpop.f32.mrb[26].mxu1  ;;  %v2028_v14 = vadd.f32 %v1858_v29, %v1732_v34 }
 0x10f   :  { %v1297_v60 = vpop.eup %1296  ;;  %1316 = vrcp.f32 %v741_v62  ;;  %v744_v7 = vadd.f32 1.0, %v1295_v23  ;;  %v353_v53 = vpop.f32.mrb[27].mxu0  ;;  %v2032_v23 = vadd.f32 %v1860_v30, %v1732_v34  ;;  %v2046_v30 = vadd.f32 %v1732_v34, %v1872_v28 }
 0x110   :  { %v1299_v45 = vpop.eup %1298  ;;  %1318 = vrcp.f32 %v712_v37  ;;  %v710_v50 = vadd.f32 1.0, %v1297_v60  ;;  %v481_v15 = vpop.f32.mrb[27].mxu1  ;;  %v2035_v37 = vadd.f32 %v1185_v36, %v1732_v34  ;;  %v2038_v60 = vadd.f32 %v1217_v0, %v1732_v34 }
 0x111   :  { %v1301_v4 = vpop.eup %1300  ;;  %1320 = vrcp.f32 %v744_v7  ;;  %v742_v10 = vadd.f32 1.0, %v1299_v45  ;;  %v2041_v29 = vadd.f32 %v1732_v34, %v353_v53  ;;  %v2049_v36 = vadd.f32 %v1732_v34, %v481_v15 }
 0x112   :  { %v1303_v62 = vpop.eup %1302  ;;  %1322 = vrcp.f32 %v710_v50  ;;  %v715_v22 = vadd.f32 1.0, %v1301_v4  ;;  %v1077_v0 = vmul.f32 -1.442695, %v2028_v14  ;;  %v2055_v53 = vadd.f32 %v1732_v34, %v1874_v35  ;;  %v1188_v4 = vpop.f32.mrb[28].mxu0 }
 0x113   :  { %v1305_v26 = vpop.eup %1304  ;;  %1324 = vrcp.f32 %v742_v10  ;;  %v747_v24 = vadd.f32 1.0, %v1303_v62  ;;  %v2065_v15 = vadd.f32 %v1188_v4, %v1732_v34  ;;  %v366_v62 = vpop.f32.mrb[29].mxu0 }
 0x114   :  { %v1307_v7 = vpop.eup %1306  ;;  %v932_v42 = vmul.f32 %v1305_v26, %v1793_v43  ;;  %1326 = vrcp.f32 %v715_v22  ;;  %v1220_v43 = vpop.f32.mrb[28].mxu1 }
 0x115   :  { %v1309_v45 = vpop.eup %1308  ;;  %v898_v50 = vmul.f32 %v1307_v7, %v1796_v46  ;;  %1328 = vrcp.f32 %v747_v24  ;;  %v1109_v46 = vmul.f32 -1.442695, %v2032_v23  ;;  %v494_v35 = vpop.f32.mrb[29].mxu1 }
 0x116   :  { %v1311_v10 = vpop.eup %1310  ;;  %997 = vst.msk [vmem:[%s2382_s3 + $0x138] sm:$0xff] %vm957_vm2, %v932_v42  ;;  %v930_v28 = vmul.f32 %v1309_v45, %v1801_v52  ;;  %1330 = vpow2.f32 %v1966_v39  ;;  %v2074_v52 = vadd.f32 %v1220_v43, %v1732_v34  ;;  %v2077_v39 = vadd.f32 %v1732_v34, %v366_v62  ;;  %v1189_v24 = vpop.f32.mrb[30].mxu0 }
 0x117   :  { %v1313_v22 = vpop.eup %1312  ;;  %963 = vst.msk [vmem:[%s2382_s3 + $0x28] sm:$0xff] %vm957_vm2, %v898_v50  ;;  %v903_v26 = vmul.f32 %v1311_v10, %v1808_v59  ;;  %1332 = vpow2.f32 %v1972_v57  ;;  %v1221_v7 = vpop.f32.mrb[30].mxu1  ;;  %v2087_v59 = vadd.f32 %v1886_v31, %v1732_v34  ;;  %v2090_v57 = vadd.f32 %v1732_v34, %v494_v35 }
 0x118   :  { %v1315_v42 = vpop.eup %1314  ;;  %995 = vst.msk [vmem:[%s2382_s3 + $0x128] sm:$0xff] %vm957_vm2, %v930_v28  ;;  %v935_v45 = vmul.f32 %v1313_v22, %v1816_v5  ;;  %1334 = vpow2.f32 %v1999_v18  ;;  %v369_v50 = vpop.f32.mrb[31].mxu0  ;;  %v1075_v5 = vmul.f32 -1.442695, %v2046_v30  ;;  %v2101_v31 = vadd.f32 %v1888_v44, %v1732_v34 }
 0x119   :  { %v497_v4 = vpop.f32.mrb[31].mxu1  ;;  %v1317_v43 = vpop.eup %1316  ;;  %968 = vst.msk [vmem:[%s2382_s3 + $0x50] sm:$0xff] %vm957_vm2, %v903_v26  ;;  %v901_v10 = vmul.f32 %v1315_v42, %v1824_v12  ;;  %1336 = vpow2.f32 %v2006_v8  ;;  %v1107_v12 = vmul.f32 -1.442695, %v2055_v53  ;;  %v2111_v8 = vadd.f32 %v1189_v24, %v1732_v34 }
 0x11a   :  { %v1319_v18 = vpop.eup %1318  ;;  %1000 = vst.msk [vmem:[%s2382_s3 + $0x150] sm:$0xff] %vm957_vm2, %v935_v45  ;;  %v933_v28 = vmul.f32 %v1317_v43, %v1831_v17  ;;  %1338 = vpow2.f32 %v2018_v48  ;;  %v2120_v35 = vadd.f32 %v1221_v7, %v1732_v34  ;;  %v2123_v17 = vadd.f32 %v1732_v34, %v369_v50 }
 0x11b   :  { %v1321_v62 = vpop.eup %1320  ;;  %966 = vst.msk [vmem:[%s2382_s3 + $0x40] sm:$0xff] %vm957_vm2, %v901_v10  ;;  %v904_v44 = vmul.f32 %v1319_v18, %v1836_v20  ;;  %1340 = vpow2.f32 %v2024_v63  ;;  %v1078_v26 = vmul.f32 -1.442695, %v2087_v59  ;;  %v2132_v20 = vadd.f32 %v1732_v34, %v497_v4 }
 0x11c   :  { %v1323_v48 = vpop.eup %1322  ;;  %998 = vst.msk [vmem:[%s2382_s3 + $0x140] sm:$0xff] %vm957_vm2, %v933_v28  ;;  %v936_v22 = vmul.f32 %v1321_v62, %v1846_v38  ;;  %1342 = vpow2.f32 %v1077_v0  ;;  %v1110_v7 = vmul.f32 -1.442695, %v2101_v31  ;;  %v1076_v38 = vmul.f32 -1.442695, %v1923_v61 }
 0x11d   :  { %v1325_v63 = vpop.eup %1324  ;;  %969 = vst.msk [vmem:[%s2382_s3 + $0x58] sm:$0xff] %vm957_vm2, %v904_v44  ;;  %v902_v24 = vmul.f32 %v1323_v48, %v1856_v41  ;;  %1344 = vpow2.f32 %v1109_v46 }
 0x11e   :  { %v1327_v42 = vpop.eup %1326  ;;  %1001 = vst.msk [vmem:[%s2382_s3 + $0x158] sm:$0xff] %vm957_vm2, %v936_v22  ;;  %v934_v34 = vmul.f32 %v1325_v63, %v1870_v33  ;;  %1346 = vpow2.f32 %v1075_v5 }
 0x11f   :  { %v1329_v0 = vpop.eup %1328  ;;  %967 = vst.msk [vmem:[%s2382_s3 + $0x48] sm:$0xff] %vm957_vm2, %v902_v24  ;;  %v907_v41 = vmul.f32 %v1327_v42, %v1884_v40  ;;  %1348 = vpow2.f32 %v1107_v12 }
 0x120   :  { %v1331_v46 = vpop.eup %1330  ;;  %999 = vst.msk [vmem:[%s2382_s3 + $0x148] sm:$0xff] %vm957_vm2, %v934_v34  ;;  %v939_v33 = vmul.f32 %v1329_v0, %v1898_v51  ;;  %1350 = vpow2.f32 %v1078_v26 }
 0x121   :  { %v1333_v45 = vpop.eup %1332  ;;  %972 = vst.msk [vmem:[%s2382_s3 + $0x70] sm:$0xff] %vm957_vm2, %v907_v41  ;;  %v713_v50 = vadd.f32 1.0, %v1331_v46  ;;  %1352 = vpow2.f32 %v1110_v7  ;;  %v1108_v46 = vmul.f32 -1.442695, %v1932_v16 }
 0x122   :  { %v1335_v4 = vpop.eup %1334  ;;  %1004 = vst.msk [vmem:[%s2382_s3 + $0x170] sm:$0xff] %vm957_vm2, %v939_v33  ;;  %v745_v40 = vadd.f32 1.0, %v1333_v45  ;;  %1354 = vpow2.f32 %v1076_v38 }
 0x123   :  { %v1337_v43 = vpop.eup %1336  ;;  %1356 = vrcp.f32 %v713_v50  ;;  %v716_v51 = vadd.f32 1.0, %v1335_v4  ;;  %v1081_v50 = vmul.f32 -1.442695, %v1949_v21 }
 0x124   :  { %v1339_v10 = vpop.eup %1338  ;;  %1358 = vrcp.f32 %v745_v40  ;;  %v748_v5 = vadd.f32 1.0, %v1337_v43  ;;  %v1113_v43 = vmul.f32 -1.442695, %v1956_v27 }
 0x125   :  { %v1341_v18 = vpop.eup %1340  ;;  %1360 = vrcp.f32 %v716_v51  ;;  %v714_v28 = vadd.f32 1.0, %v1339_v10 }
 0x126   :  { %v1343_v12 = vpop.eup %1342  ;;  %1362 = vrcp.f32 %v748_v5  ;;  %v746_v62 = vadd.f32 1.0, %v1341_v18  ;;  %v1079_v5 = vmul.f32 -1.442695, %v1959_v25 }
 0x127   :  { %v1345_v44 = vpop.eup %1344  ;;  %1364 = vrcp.f32 %v714_v28  ;;  %v719_v48 = vadd.f32 1.0, %v1343_v12 }
 0x128   :  { %v1347_v22 = vpop.eup %1346  ;;  %1366 = vrcp.f32 %v746_v62  ;;  %v751_v26 = vadd.f32 1.0, %v1345_v44  ;;  %v1082_v62 = vmul.f32 -1.442695, %v1983_v55 }
 0x129   :  { %v1349_v63 = vpop.eup %1348  ;;  %1368 = vrcp.f32 %v719_v48  ;;  %v717_v24 = vadd.f32 1.0, %v1347_v22  ;;  %v1114_v48 = vmul.f32 -1.442695, %v1986_v54 }
 0x12a   :  { %v1351_v7 = vpop.eup %1350  ;;  %1370 = vrcp.f32 %v751_v26  ;;  %v749_v42 = vadd.f32 1.0, %v1349_v63  ;;  %v1080_v26 = vmul.f32 -1.442695, %v1989_v11 }
 0x12b   :  { %v1353_v34 = vpop.eup %1352  ;;  %1372 = vrcp.f32 %v717_v24  ;;  %v720_v38 = vadd.f32 1.0, %v1351_v7  ;;  %v1112_v24 = vmul.f32 -1.442695, %v1996_v6 }
 0x12c   :  { %v1355_v0 = vpop.eup %1354  ;;  %1374 = vrcp.f32 %v749_v42  ;;  %v752_v41 = vadd.f32 1.0, %v1353_v34  ;;  %v1085_v42 = vmul.f32 -1.442695, %v2009_v2 }
 0x12d   :  { %v1357_v33 = vpop.eup %1356  ;;  %1376 = vrcp.f32 %v720_v38  ;;  %v718_v45 = vadd.f32 1.0, %v1355_v0  ;;  %v1117_v38 = vmul.f32 -1.442695, %v2012_v32 }
 0x12e   :  { %v1359_v4 = vpop.eup %1358  ;;  %v905_v40 = vmul.f32 %v1357_v33, %v1914_v9  ;;  %1378 = vrcp.f32 %v752_v41  ;;  %v1111_v9 = vmul.f32 -1.442695, %v1969_v47  ;;  %v1083_v41 = vmul.f32 -1.442695, %v2015_v13 }
 0x12f   :  { %v1361_v51 = vpop.eup %1360  ;;  %v937_v10 = vmul.f32 %v1359_v4, %v1941_v19  ;;  %1380 = vrcp.f32 %v718_v45  ;;  %v1115_v33 = vmul.f32 -1.442695, %v2021_v49 }
 0x130   :  { %v1363_v18 = vpop.eup %1362  ;;  %970 = vst.msk [vmem:[%s2382_s3 + $0x60] sm:$0xff] %vm957_vm2, %v905_v40  ;;  %v908_v28 = vmul.f32 %v1361_v51, %v1976_v58  ;;  %1382 = vpow2.f32 %v1108_v46 }
 0x131   :  { %v1365_v12 = vpop.eup %1364  ;;  %1002 = vst.msk [vmem:[%s2382_s3 + $0x160] sm:$0xff] %vm957_vm2, %v937_v10  ;;  %v940_v19 = vmul.f32 %v1363_v18, %v1980_v3  ;;  %1384 = vpow2.f32 %v1081_v50 }
 0x132   :  { %v1367_v44 = vpop.eup %1366  ;;  %973 = vst.msk [vmem:[%s2382_s3 + $0x78] sm:$0xff] %vm957_vm2, %v908_v28  ;;  %v906_v58 = vmul.f32 %v1365_v12, %v1993_v56  ;;  %1386 = vpow2.f32 %v1113_v43 }
 0x133   :  { %v1369_v22 = vpop.eup %1368  ;;  %1005 = vst.msk [vmem:[%s2382_s3 + $0x178] sm:$0xff] %vm957_vm2, %v940_v19  ;;  %v938_v3 = vmul.f32 %v1367_v44, %v2003_v1  ;;  %1388 = vpow2.f32 %v1079_v5 }
 0x134   :  { %v1371_v63 = vpop.eup %1370  ;;  %971 = vst.msk [vmem:[%s2382_s3 + $0x68] sm:$0xff] %vm957_vm2, %v906_v58  ;;  %v911_v56 = vmul.f32 %v1369_v22, %v2028_v14  ;;  %1390 = vpow2.f32 %v1111_v9 }
 0x135   :  { %v1373_v7 = vpop.eup %1372  ;;  %1003 = vst.msk [vmem:[%s2382_s3 + $0x168] sm:$0xff] %vm957_vm2, %v938_v3  ;;  %v943_v1 = vmul.f32 %v1371_v63, %v2032_v23  ;;  %1392 = vpow2.f32 %v1082_v62 }
 0x136   :  { %v1375_v34 = vpop.eup %1374  ;;  %976 = vst.msk [vmem:[%s2382_s3 + $0x90] sm:$0xff] %vm957_vm2, %v911_v56  ;;  %v909_v14 = vmul.f32 %v1373_v7, %v2046_v30  ;;  %1394 = vpow2.f32 %v1114_v48 }
 0x137   :  { %v1377_v0 = vpop.eup %1376  ;;  %1008 = vst.msk [vmem:[%s2382_s3 + $0x190] sm:$0xff] %vm957_vm2, %v943_v1  ;;  %v941_v23 = vmul.f32 %v1375_v34, %v2055_v53  ;;  %1396 = vpow2.f32 %v1080_v26  ;;  %v1086_v1 = vmul.f32 -1.442695, %v2035_v37 }
 0x138   :  { %v1379_v46 = vpop.eup %1378  ;;  %974 = vst.msk [vmem:[%s2382_s3 + $0x80] sm:$0xff] %vm957_vm2, %v909_v14  ;;  %v912_v30 = vmul.f32 %v1377_v0, %v2087_v59  ;;  %1398 = vpow2.f32 %v1112_v24  ;;  %v1118_v14 = vmul.f32 -1.442695, %v2038_v60 }
 0x139   :  { %v1381_v45 = vpop.eup %1380  ;;  %1006 = vst.msk [vmem:[%s2382_s3 + $0x180] sm:$0xff] %vm957_vm2, %v941_v23  ;;  %v944_v53 = vmul.f32 %v1379_v46, %v2101_v31  ;;  %1400 = vpow2.f32 %v1085_v42  ;;  %v1084_v23 = vmul.f32 -1.442695, %v2041_v29 }
 0x13a   :  { %v1383_v50 = vpop.eup %1382  ;;  %977 = vst.msk [vmem:[%s2382_s3 + $0x98] sm:$0xff] %vm957_vm2, %v912_v30  ;;  %v910_v59 = vmul.f32 %v1381_v45, %v1923_v61  ;;  %1402 = vpow2.f32 %v1117_v38  ;;  %v1116_v30 = vmul.f32 -1.442695, %v2049_v36 }
 0x13b   :  { %v1385_v4 = vpop.eup %1384  ;;  %1009 = vst.msk [vmem:[%s2382_s3 + $0x198] sm:$0xff] %vm957_vm2, %v944_v53  ;;  %v750_v40 = vadd.f32 1.0, %v1383_v50  ;;  %1404 = vpow2.f32 %v1083_v41  ;;  %v1121_v50 = vmul.f32 -1.442695, %v2074_v52 }
 0x13c   :  { %v1387_v43 = vpop.eup %1386  ;;  %975 = vst.msk [vmem:[%s2382_s3 + $0x88] sm:$0xff] %vm957_vm2, %v910_v59  ;;  %v723_v31 = vadd.f32 1.0, %v1385_v4  ;;  %1406 = vpow2.f32 %v1115_v33  ;;  %v1087_v4 = vmul.f32 -1.442695, %v2077_v39 }
 0x13d   :  { %v1389_v51 = vpop.eup %1388  ;;  %1408 = vrcp.f32 %v750_v40  ;;  %v755_v61 = vadd.f32 1.0, %v1387_v43  ;;  %v1119_v43 = vmul.f32 -1.442695, %v2090_v57 }
 0x13e   :  { %v1391_v10 = vpop.eup %1390  ;;  %1410 = vrcp.f32 %v723_v31  ;;  %v721_v5 = vadd.f32 1.0, %v1389_v51  ;;  %v1090_v51 = vmul.f32 -1.442695, %v2111_v8 }
 0x13f   :  { %v1393_v18 = vpop.eup %1392  ;;  %1412 = vrcp.f32 %v755_v61  ;;  %v753_v28 = vadd.f32 1.0, %v1391_v10  ;;  %v1122_v10 = vmul.f32 -1.442695, %v2120_v35 }
 0x140   :  { %v1395_v9 = vpop.eup %1394  ;;  %1414 = vrcp.f32 %v721_v5  ;;  %v724_v12 = vadd.f32 1.0, %v1393_v18  ;;  %v1088_v18 = vmul.f32 -1.442695, %v2123_v17 }
 0x141   :  { %v1397_v19 = vpop.eup %1396  ;;  %1416 = vrcp.f32 %v753_v28  ;;  %v756_v62 = vadd.f32 1.0, %v1395_v9  ;;  %v1120_v9 = vmul.f32 -1.442695, %v2132_v20 }
 0x142   :  { %v1399_v44 = vpop.eup %1398  ;;  %1418 = vrcp.f32 %v724_v12  ;;  %v722_v58 = vadd.f32 1.0, %v1397_v19 }
 0x143   :  { %v1401_v48 = vpop.eup %1400  ;;  %1420 = vrcp.f32 %v756_v62  ;;  %v754_v22 = vadd.f32 1.0, %v1399_v44 }
 0x144   :  { %v1403_v3 = vpop.eup %1402  ;;  %1422 = vrcp.f32 %v722_v58  ;;  %v727_v26 = vadd.f32 1.0, %v1401_v48 }
 0x145   :  { %v1405_v63 = vpop.eup %1404  ;;  %1424 = vrcp.f32 %v754_v22  ;;  %v759_v56 = vadd.f32 1.0, %v1403_v3 }
 0x146   :  { %v1407_v24 = vpop.eup %1406  ;;  %1426 = vrcp.f32 %v727_v26  ;;  %v725_v7 = vadd.f32 1.0, %v1405_v63 }
 0x147   :  { %v1409_v42 = vpop.eup %1408  ;;  %1428 = vrcp.f32 %v759_v56  ;;  %v757_v34 = vadd.f32 1.0, %v1407_v24 }
 0x148   :  { %v1411_v38 = vpop.eup %1410  ;;  %v942_v0 = vmul.f32 %v1409_v42, %v1932_v16  ;;  %1430 = vrcp.f32 %v725_v7  ;;  %v1089_v16 = vmul.f32 -1.442695, %v2065_v15 }
 0x149   :  { %v1413_v41 = vpop.eup %1412  ;;  %v915_v46 = vmul.f32 %v1411_v38, %v1949_v21  ;;  %1432 = vrcp.f32 %v757_v34 }
 0x14a   :  { %v1415_v33 = vpop.eup %1414  ;;  %1007 = vst.msk [vmem:[%s2382_s3 + $0x188] sm:$0xff] %vm957_vm2, %v942_v0  ;;  %v947_v45 = vmul.f32 %v1413_v41, %v1956_v27  ;;  %1434 = vpow2.f32 %v1086_v1 }
 0x14b   :  { %v1417_v53 = vpop.eup %1416  ;;  %980 = vst.msk [vmem:[%s2382_s3 + $0xb0] sm:$0xff] %vm957_vm2, %v915_v46  ;;  %v913_v21 = vmul.f32 %v1415_v33, %v1959_v25  ;;  %1436 = vpow2.f32 %v1118_v14 }
 0x14c   :  { %v1419_v59 = vpop.eup %1418  ;;  %1012 = vst.msk [vmem:[%s2382_s3 + $0x1b0] sm:$0xff] %vm957_vm2, %v947_v45  ;;  %v945_v27 = vmul.f32 %v1417_v53, %v1969_v47  ;;  %1438 = vpow2.f32 %v1084_v23 }
 0x14d   :  { %v1421_v40 = vpop.eup %1420  ;;  %978 = vst.msk [vmem:[%s2382_s3 + $0xa0] sm:$0xff] %vm957_vm2, %v913_v21  ;;  %v916_v25 = vmul.f32 %v1419_v59, %v1983_v55  ;;  %1440 = vpow2.f32 %v1116_v30 }
 0x14e   :  { %v1423_v31 = vpop.eup %1422  ;;  %1010 = vst.msk [vmem:[%s2382_s3 + $0x1a0] sm:$0xff] %vm957_vm2, %v945_v27  ;;  %v948_v47 = vmul.f32 %v1421_v40, %v1986_v54  ;;  %1442 = vpow2.f32 %v1089_v16 }
 0x14f   :  { %v1425_v61 = vpop.eup %1424  ;;  %981 = vst.msk [vmem:[%s2382_s3 + $0xb8] sm:$0xff] %vm957_vm2, %v916_v25  ;;  %v914_v55 = vmul.f32 %v1423_v31, %v1989_v11  ;;  %1444 = vpow2.f32 %v1121_v50 }
 0x150   :  { %v1427_v5 = vpop.eup %1426  ;;  %1013 = vst.msk [vmem:[%s2382_s3 + $0x1b8] sm:$0xff] %vm957_vm2, %v948_v47  ;;  %v946_v54 = vmul.f32 %v1425_v61, %v1996_v6  ;;  %1446 = vpow2.f32 %v1087_v4 }
 0x151   :  { %v1429_v28 = vpop.eup %1428  ;;  %979 = vst.msk [vmem:[%s2382_s3 + $0xa8] sm:$0xff] %vm957_vm2, %v914_v55  ;;  %v919_v11 = vmul.f32 %v1427_v5, %v2009_v2  ;;  %1448 = vpow2.f32 %v1119_v43 }
 0x152   :  { %v1431_v12 = vpop.eup %1430  ;;  %1011 = vst.msk [vmem:[%s2382_s3 + $0x1a8] sm:$0xff] %vm957_vm2, %v946_v54  ;;  %v951_v6 = vmul.f32 %v1429_v28, %v2012_v32  ;;  %1450 = vpow2.f32 %v1090_v51 }
 0x153   :  { %v1433_v19 = vpop.eup %1432  ;;  %984 = vst.msk [vmem:[%s2382_s3 + $0xd0] sm:$0xff] %vm957_vm2, %v919_v11  ;;  %v917_v2 = vmul.f32 %v1431_v12, %v2015_v13  ;;  %1452 = vpow2.f32 %v1122_v10 }
 0x154   :  { %v1435_v62 = vpop.eup %1434  ;;  %1016 = vst.msk [vmem:[%s2382_s3 + $0x1d0] sm:$0xff] %vm957_vm2, %v951_v6  ;;  %v949_v44 = vmul.f32 %v1433_v19, %v2021_v49  ;;  %1454 = vpow2.f32 %v1088_v18 }
 0x155   :  { %v1437_v32 = vpop.eup %1436  ;;  %982 = vst.msk [vmem:[%s2382_s3 + $0xc0] sm:$0xff] %vm957_vm2, %v917_v2  ;;  %v728_v58 = vadd.f32 1.0, %v1435_v62  ;;  %1456 = vpow2.f32 %v1120_v9 }
 0x156   :  { %v1439_v48 = vpop.eup %1438  ;;  %1014 = vst.msk [vmem:[%s2382_s3 + $0x1c0] sm:$0xff] %vm957_vm2, %v949_v44  ;;  %v760_v13 = vadd.f32 1.0, %v1437_v32 }
 0x157   :  { %v1441_v22 = vpop.eup %1440  ;;  %1458 = vrcp.f32 %v728_v58  ;;  %v726_v3 = vadd.f32 1.0, %v1439_v48 }
 0x158   :  { %v1443_v49 = vpop.eup %1442  ;;  %1460 = vrcp.f32 %v760_v13  ;;  %v758_v26 = vadd.f32 1.0, %v1441_v22 }
 0x159   :  { %v1445_v63 = vpop.eup %1444  ;;  %1462 = vrcp.f32 %v726_v3  ;;  %v731_v56 = vadd.f32 1.0, %v1443_v49 }
 0x15a   :  { %v1447_v24 = vpop.eup %1446  ;;  %1464 = vrcp.f32 %v758_v26  ;;  %v763_v7 = vadd.f32 1.0, %v1445_v63 }
 0x15b   :  { %v1449_v1 = vpop.eup %1448  ;;  %1466 = vrcp.f32 %v731_v56  ;;  %v729_v42 = vadd.f32 1.0, %v1447_v24 }
 0x15c   :  { %v1451_v34 = vpop.eup %1450  ;;  %1468 = vrcp.f32 %v763_v7  ;;  %v761_v14 = vadd.f32 1.0, %v1449_v1 }
 0x15d   :  { %v1453_v38 = vpop.eup %1452  ;;  %1470 = vrcp.f32 %v729_v42  ;;  %v732_v0 = vadd.f32 1.0, %v1451_v34 }
 0x15e   :  { %v1455_v23 = vpop.eup %1454  ;;  %1472 = vrcp.f32 %v761_v14  ;;  %v764_v41 = vadd.f32 1.0, %v1453_v38 }
 0x15f   :  { %v1457_v46 = vpop.eup %1456  ;;  %1474 = vrcp.f32 %v732_v0  ;;  %v730_v30 = vadd.f32 1.0, %v1455_v23 }
 0x160   :  { %1476 = vrcp.f32 %v764_v41  ;;  %v762_v33 = vadd.f32 1.0, %v1457_v46 }
 0x161   :  { %v1459_v45 = vpop.eup %1458  ;;  %1478 = vrcp.f32 %v730_v30 }
 0x162   :  { %v1461_v16 = vpop.eup %1460  ;;  %v920_v53 = vmul.f32 %v1459_v45, %v2035_v37  ;;  %1480 = vrcp.f32 %v762_v33 }
 0x163   :  { %v1463_v21 = vpop.eup %1462  ;;  %v952_v50 = vmul.f32 %v1461_v16, %v2038_v60 }
 0x164   :  { %v1465_v59 = vpop.eup %1464  ;;  %985 = vst.msk [vmem:[%s2382_s3 + $0xd8] sm:$0xff] %vm957_vm2, %v920_v53  ;;  %v918_v27 = vmul.f32 %v1463_v21, %v2041_v29 }
 0x165   :  { %v1467_v4 = vpop.eup %1466  ;;  %1017 = vst.msk [vmem:[%s2382_s3 + $0x1d8] sm:$0xff] %vm957_vm2, %v952_v50  ;;  %v950_v37 = vmul.f32 %v1465_v59, %v2049_v36 }
 0x166   :  { %v1469_v40 = vpop.eup %1468  ;;  %983 = vst.msk [vmem:[%s2382_s3 + $0xc8] sm:$0xff] %vm957_vm2, %v918_v27  ;;  %v923_v60 = vmul.f32 %v1467_v4, %v2065_v15 }
 0x167   :  { %v1471_v25 = vpop.eup %1470  ;;  %1015 = vst.msk [vmem:[%s2382_s3 + $0x1c8] sm:$0xff] %vm957_vm2, %v950_v37  ;;  %v955_v29 = vmul.f32 %v1469_v40, %v2074_v52 }
 0x168   :  { %v1473_v43 = vpop.eup %1472  ;;  %988 = vst.msk [vmem:[%s2382_s3 + $0xf0] sm:$0xff] %vm957_vm2, %v923_v60  ;;  %v921_v36 = vmul.f32 %v1471_v25, %v2077_v39 }
 0x169   :  { %v1475_v31 = vpop.eup %1474  ;;  %1020 = vst.msk [vmem:[%s2382_s3 + $0x1f0] sm:$0xff] %vm957_vm2, %v955_v29  ;;  %v953_v15 = vmul.f32 %v1473_v43, %v2090_v57 }
 0x16a   :  { %v1477_v47 = vpop.eup %1476  ;;  %986 = vst.msk [vmem:[%s2382_s3 + $0xe0] sm:$0xff] %vm957_vm2, %v921_v36  ;;  %v924_v52 = vmul.f32 %v1475_v31, %v2111_v8 }
 0x16b   :  { %v1479_v51 = vpop.eup %1478  ;;  %1018 = vst.msk [vmem:[%s2382_s3 + $0x1e0] sm:$0xff] %vm957_vm2, %v953_v15  ;;  %v956_v39 = vmul.f32 %v1477_v47, %v2120_v35 }
 0x16c   :  { %v1481_v61 = vpop.eup %1480  ;;  %989 = vst.msk [vmem:[%s2382_s3 + $0xf8] sm:$0xff] %vm957_vm2, %v924_v52  ;;  %v922_v57 = vmul.f32 %v1479_v51, %v2123_v17 }
 0x16d   :  { %1021 = vst.msk [vmem:[%s2382_s3 + $0x1f8] sm:$0xff] %vm957_vm2, %v956_v39  ;;  %v954_v8 = vmul.f32 %v1481_v61, %v2132_v20 }
 0x16e   :  { %987 = vst.msk [vmem:[%s2382_s3 + $0xe8] sm:$0xff] %vm957_vm2, %v922_v57 }
 0x16f   :  { %1019 = vst.msk [vmem:[%s2382_s3 + $0x1e8] sm:$0xff] %vm957_vm2, %v954_v8 }

</bundles_post_ra>
